<compile_context>
chip_gen: v5e
topology: v5e:2x2
jax: 0.10.0
libtpu: 0.0.40
codegen_flags: <defaults>
</compile_context>

<pallas_src>
import jax
import jax.numpy as jnp
from jax import lax
from jax.experimental import pallas as pl
from jax.experimental.pallas import tpu as pltpu

BN_EPS = 1e-5
LANE = 128
SUBLANE_BF16 = 16  # bf16 packs 16 rows per sublane tile


def _round_up(n, m):
    return ((n + m - 1) // m) * m


def _layer_dims(num_features, num_classes):
    conv = [(num_features, 32), (32, 64), (64, 128)]
    fc = [(128, 256), (256, 128), (128, 64), (64, num_classes)]
    return conv, fc


def _build_layout(num_features, num_classes):
    """Row layout of the packed weight buffer.

    Returns (layout, total_rows, lane_pack, last_w); layout entries are
    (row_offset, cin_padded, cout, bias_row) for the 3 convs then 4 fcs.
    """
    conv, fc = _layer_dims(num_features, num_classes)
    layout = []
    off = 0
    for b_row, (cin, cout) in enumerate(conv + fc):
        cin_p = _round_up(cin, SUBLANE_BF16)
        layout.append((off, cin_p, cout, b_row))
        off += cin_p
    total_rows = _round_up(off, SUBLANE_BF16)
    last_w = _round_up(max(num_classes, 1), LANE)   # fc4 compute width
    lane_pack = max(256, last_w)                    # packed buffer lane width
    return layout, total_rows, lane_pack, last_w


def _full_spec(arr):
    # Tiny / no-grid call: one full-array block resident in VMEM.
    return pl.BlockSpec(arr.shape, lambda: (0,) * arr.ndim)


# ---------------------------------------------------------------------------
# Single fused Pallas kernel for the whole network
# ---------------------------------------------------------------------------
def _make_kernel(layout, last_w, num_classes):
    n_layers = len(layout)

    def kernel(a_ref, x_ref, w_ref, b_ref, o_ref):
        a = a_ref[...]                                   # (N, N)   bf16
        h = x_ref[...]                                   # (N, Fpad) bf16
        for li, (off, cin_p, cout, b_row) in enumerate(layout):
            last = li == n_layers - 1
            cw = last_w if last else cout
            w = w_ref[off:off + cin_p, :cw]              # static slice (bf16)
            if li < 3:
                # GCNConv: aggregate first (cheaper contraction order):
                # (A_hat @ H) @ W'  — BN already folded into W'/b'.
                h = jnp.dot(a, h, preferred_element_type=jnp.float32
                            ).astype(jnp.bfloat16)
            z = jnp.dot(h, w, preferred_element_type=jnp.float32)
            z = z + b_ref[b_row:b_row + 1, :cw]          # f32 bias
            if last:
                # Write only the real logits columns (tiny masked store).
                o_ref[...] = z[:, :num_classes]
            else:
                # ReLU (Dropout = identity in eval mode).
                h = jnp.maximum(z, 0.0).astype(jnp.bfloat16)

    return kernel


def advanced_gcn_forward(prepped, x, a_hat, num_features, num_classes):
    """Fused eval-mode forward pass; returns (N, num_classes) float32."""
    layout, _, _, last_w = _build_layout(num_features, num_classes)
    n = x.shape[0]
    f_pad = layout[0][1]
    x_bf = jnp.pad(x, ((0, 0), (0, f_pad - x.shape[1]))).astype(jnp.bfloat16)
    a_bf = a_hat.astype(jnp.bfloat16)

    args = (a_bf, x_bf, prepped["w_pack"], prepped["b_pack"])
    kernel = _make_kernel(layout, last_w, num_classes)

    return pl.pallas_call(
        kernel,
        out_shape=jax.ShapeDtypeStruct((n, num_classes), jnp.float32),
        in_specs=[_full_spec(a) for a in args],
        out_specs=pl.BlockSpec((n, num_classes), lambda: (0, 0)),
        compiler_params=pltpu.CompilerParams(vmem_limit_bytes=4 << 20),
    )(*args)


# ---------------------------------------------------------------------------
# Parameter construction (deterministic, shapes per AdvancedGCN.__init__)
# ---------------------------------------------------------------------------
def make_params(key, num_features, num_classes):
    dims_gcn, dims_fc = _layer_dims(num_features, num_classes)
    params = {}
    keys = jax.random.split(key, 32)
    k = iter(keys)

    for i, (cin, cout) in enumerate(dims_gcn, start=1):
        scale = 1.0 / jnp.sqrt(jnp.float32(cin))
        params[f"conv{i}_w"] = (jax.random.normal(next(k), (cin, cout),
                                                  jnp.float32) * scale)
        params[f"conv{i}_b"] = (jax.random.normal(next(k), (1, cout),
                                                  jnp.float32) * 0.01)
        params[f"bn{i}_gamma"] = 1.0 + 0.1 * jax.random.normal(
            next(k), (1, cout), jnp.float32)
        params[f"bn{i}_beta"] = 0.1 * jax.random.normal(
            next(k), (1, cout), jnp.float32)
        params[f"bn{i}_mean"] = 0.05 * jax.random.normal(
            next(k), (1, cout), jnp.float32)
        params[f"bn{i}_var"] = 1.0 + 0.1 * jax.random.uniform(
            next(k), (1, cout), jnp.float32)

    for i, (cin, cout) in enumerate(dims_fc, start=1):
        scale = 1.0 / jnp.sqrt(jnp.float32(cin))
        params[f"fc{i}_w"] = (jax.random.normal(next(k), (cin, cout),
                                                jnp.float32) * scale)
        params[f"fc{i}_b"] = (jax.random.normal(next(k), (1, cout),
                                                jnp.float32) * 0.01)
    return params


def fold_and_pack_params(params, num_features, num_classes):
    """Fold eval-mode BatchNorm into the conv layers and pack all 7 layers
    into two buffers:
      w_pack : (total_rows, lane_pack) bf16 — layer i occupies rows
               [off_i, off_i + cin_pad_i), cols [0, cout_i); zeros elsewhere.
      b_pack : (8, lane_pack) f32 — bias of layer i in row i, cols [0, cout_i).
    """
    layout, total_rows, lane_pack, _ = _build_layout(num_features, num_classes)
    names = ("conv1", "conv2", "conv3", "fc1", "fc2", "fc3", "fc4")
    w_pack = jnp.zeros((total_rows, lane_pack), jnp.float32)
    b_pack = jnp.zeros((8, lane_pack), jnp.float32)
    for (off, _cin_p, cout, b_row), name in zip(layout, names):
        w = params[f"{name}_w"]
        b = params[f"{name}_b"]
        if name.startswith("conv"):
            i = name[-1]
            s = params[f"bn{i}_gamma"] * lax.rsqrt(params[f"bn{i}_var"]
                                                   + BN_EPS)       # (1, Cout)
            w = w * s                                              # col scale
            b = b * s + params[f"bn{i}_beta"] - params[f"bn{i}_mean"] * s
        w_pack = w_pack.at[off:off + w.shape[0], :cout].set(w)
        b_pack = b_pack.at[b_row, :cout].set(b[0])
    return {"w_pack": w_pack.astype(jnp.bfloat16), "b_pack": b_pack}


def build_normalized_adjacency(edge_index, num_nodes):
    """Dense A_hat = D^{-1/2} (A + I) D^{-1/2} (PyG GCNConv normalization)."""
    src, dst = edge_index
    adj = jnp.zeros((num_nodes, num_nodes), jnp.float32)
    adj = adj.at[src, dst].set(1.0)
    adj = adj + jnp.eye(num_nodes, dtype=jnp.float32)      # self loops
    deg = jnp.sum(adj, axis=1)
    d_inv_sqrt = jnp.where(deg > 0, 1.0 / jnp.sqrt(deg), 0.0)
    return adj * d_inv_sqrt[:, None] * d_inv_sqrt[None, :]


# ---------------------------------------------------------------------------
# Pure-JAX references for correctness checking
# ---------------------------------------------------------------------------
def reference_forward_f32(params, x, a_hat):
    """Full-precision reference (unfolded BN, unpacked, f32)."""
    h = x
    for i in (1, 2, 3):
        h = a_hat @ (h @ params[f"conv{i}_w"]) + params[f"conv{i}_b"]
        inv = lax.rsqrt(params[f"bn{i}_var"] + BN_EPS)
        h = ((h - params[f"bn{i}_mean"]) * inv * params[f"bn{i}_gamma"]
             + params[f"bn{i}_beta"])
        h = jnp.maximum(h, 0.0)
    for i in (1, 2, 3):
        h = jnp.maximum(h @ params[f"fc{i}_w"] + params[f"fc{i}_b"], 0.0)
    return h @ params["fc4_w"] + params["fc4_b"]


def reference_forward_packed(prepped, x, a_hat, num_features, num_classes):
    """Pure-JAX reference with the SAME packed bf16 params / casts as the
    kernel (validates the kernel itself to tight tolerance)."""
    layout, _, _, last_w = _build_layout(num_features, num_classes)
    f_pad = layout[0][1]
    h = jnp.pad(x, ((0, 0), (0, f_pad - x.shape[1]))).astype(jnp.bfloat16)
    a = a_hat.astype(jnp.bfloat16)
    wp, bp = prepped["w_pack"], prepped["b_pack"]
    for li, (off, cin_p, cout, b_row) in enumerate(layout):
        last = li == len(layout) - 1
        cw = last_w if last else cout
        w = wp[off:off + cin_p, :cw]
        if li < 3:
            h = jnp.dot(a, h, preferred_element_type=jnp.float32
                        ).astype(jnp.bfloat16)
        z = jnp.dot(h, w, preferred_element_type=jnp.float32)
        z = z + bp[b_row:b_row + 1, :cw]
        if last:
            return z[:, :num_classes]
        h = jnp.maximum(z, 0.0).astype(jnp.bfloat16)


if __name__ == "__main__":
    num_nodes = 16
    num_features = 8
    num_classes = 4

    key = jax.random.PRNGKey(0)
    k_x, k_p = jax.random.split(key)

    # Node features [N, F].
    x = jax.random.normal(k_x, (num_nodes, num_features), jnp.float32)

    # Simple bidirectional ring graph: edges (i, i+1 mod N) and reverse.
    idx = jnp.arange(num_nodes)
    src = jnp.concatenate([idx, (idx + 1) % num_nodes])
    dst = jnp.concatenate([(idx + 1) % num_nodes, idx])
    edge_index = jnp.stack([src, dst])                     # [2, 2N]

    a_hat = build_normalized_adjacency(edge_index, num_nodes)
    params = make_params(k_p, num_features, num_classes)
    prepped = fold_and_pack_params(params, num_features, num_classes)

    out = advanced_gcn_forward(prepped, x, a_hat, num_features, num_classes)
    out = jax.block_until_ready(out)

    assert out.shape == (num_nodes, num_classes), out.shape
    assert bool(jnp.all(jnp.isfinite(out)))

    # 1) Kernel vs matched-precision (packed bf16) reference: near-exact.
    ref_bf = reference_forward_packed(prepped, x, a_hat, num_features,
                                      num_classes)
    err_bf = float(jnp.max(jnp.abs(out - ref_bf)))
    assert bool(jnp.allclose(out, ref_bf, rtol=1e-3, atol=1e-3)), err_bf

    # 2) Kernel vs full-f32 unfolded reference: bf16-appropriate tolerance.
    ref_f32 = reference_forward_f32(params, x, a_hat)
    err_f32 = float(jnp.max(jnp.abs(out - ref_f32)))
    assert bool(jnp.allclose(out, ref_f32, rtol=5e-2, atol=5e-2)), err_f32

    print("KERNEL_OK")
</pallas_src>

<mosaic_0001>
module attributes {stable_mosaic.version = 11 : i64} {
  func.func @kernel(%arg0: memref<16x16xbf16, #tpu.memory_space<vmem>>, %arg1: memref<16x16xbf16, #tpu.memory_space<vmem>>, %arg2: memref<688x256xbf16, #tpu.memory_space<vmem>>, %arg3: memref<8x256xf32, #tpu.memory_space<vmem>>, %arg4: memref<16x4xf32, #tpu.memory_space<vmem>>) attributes {dimension_semantics = [], scalar_prefetch = 0 : i64, scratch_operands = 0 : i64, tpu.core_type = #tpu.core_type<tc>} {
    %c0 = arith.constant 0 : index
    %c0_0 = arith.constant 0 : index
    %0 = vector.load %arg0[%c0, %c0_0] : memref<16x16xbf16, #tpu.memory_space<vmem>>, vector<16x16xbf16>
    %c0_1 = arith.constant 0 : index
    %c0_2 = arith.constant 0 : index
    %1 = vector.load %arg1[%c0_1, %c0_2] : memref<16x16xbf16, #tpu.memory_space<vmem>>, vector<16x16xbf16>
    %c0_3 = arith.constant 0 : index
    %c0_4 = arith.constant 0 : index
    %2 = vector.load %arg2[%c0_3, %c0_4] : memref<688x256xbf16, #tpu.memory_space<vmem>>, vector<16x32xbf16>
    %cst = arith.constant dense<0.000000e+00> : vector<16x16xf32>
    %3 = tpu.matmul %0, %1, %cst {dimension_numbers = #tpu.dot_dimension_numbers<[1], [0], [0], [1], [0, 0, 1, 1], [], []>} : vector<16x16xbf16>, vector<16x16xbf16>, vector<16x16xf32> -> vector<16x16xf32>
    %4 = arith.truncf %3 : vector<16x16xf32> to vector<16x16xbf16>
    %cst_5 = arith.constant dense<0.000000e+00> : vector<16x32xf32>
    %5 = tpu.matmul %4, %2, %cst_5 {dimension_numbers = #tpu.dot_dimension_numbers<[1], [0], [0], [1], [0, 0, 1, 1], [], []>} : vector<16x16xbf16>, vector<16x32xbf16>, vector<16x32xf32> -> vector<16x32xf32>
    %c0_6 = arith.constant 0 : index
    %c0_7 = arith.constant 0 : index
    %6 = vector.load %arg3[%c0_6, %c0_7] : memref<8x256xf32, #tpu.memory_space<vmem>>, vector<1x32xf32>
    %7 = vector.broadcast %6 : vector<1x32xf32> to vector<16x32xf32>
    %8 = arith.addf %5, %7 : vector<16x32xf32>
    %cst_8 = arith.constant 0.000000e+00 : f32
    %9 = vector.broadcast %cst_8 : f32 to vector<16x32xf32>
    %10 = arith.maximumf %8, %9 : vector<16x32xf32>
    %11 = arith.truncf %10 : vector<16x32xf32> to vector<16x32xbf16>
    %c16 = arith.constant 16 : index
    %c0_9 = arith.constant 0 : index
    %12 = vector.load %arg2[%c16, %c0_9] : memref<688x256xbf16, #tpu.memory_space<vmem>>, vector<32x64xbf16>
    %cst_10 = arith.constant dense<0.000000e+00> : vector<16x32xf32>
    %13 = tpu.matmul %0, %11, %cst_10 {dimension_numbers = #tpu.dot_dimension_numbers<[1], [0], [0], [1], [0, 0, 1, 1], [], []>} : vector<16x16xbf16>, vector<16x32xbf16>, vector<16x32xf32> -> vector<16x32xf32>
    %14 = arith.truncf %13 : vector<16x32xf32> to vector<16x32xbf16>
    %cst_11 = arith.constant dense<0.000000e+00> : vector<16x64xf32>
    %15 = tpu.matmul %14, %12, %cst_11 {dimension_numbers = #tpu.dot_dimension_numbers<[1], [0], [0], [1], [0, 0, 1, 1], [], []>} : vector<16x32xbf16>, vector<32x64xbf16>, vector<16x64xf32> -> vector<16x64xf32>
    %c1 = arith.constant 1 : index
    %c0_12 = arith.constant 0 : index
    %16 = vector.load %arg3[%c1, %c0_12] : memref<8x256xf32, #tpu.memory_space<vmem>>, vector<1x64xf32>
    %17 = vector.broadcast %16 : vector<1x64xf32> to vector<16x64xf32>
    %18 = arith.addf %15, %17 : vector<16x64xf32>
    %cst_13 = arith.constant 0.000000e+00 : f32
    %19 = vector.broadcast %cst_13 : f32 to vector<16x64xf32>
    %20 = arith.maximumf %18, %19 : vector<16x64xf32>
    %21 = arith.truncf %20 : vector<16x64xf32> to vector<16x64xbf16>
    %c48 = arith.constant 48 : index
    %c0_14 = arith.constant 0 : index
    %22 = vector.load %arg2[%c48, %c0_14] : memref<688x256xbf16, #tpu.memory_space<vmem>>, vector<64x128xbf16>
    %cst_15 = arith.constant dense<0.000000e+00> : vector<16x64xf32>
    %23 = tpu.matmul %0, %21, %cst_15 {dimension_numbers = #tpu.dot_dimension_numbers<[1], [0], [0], [1], [0, 0, 1, 1], [], []>} : vector<16x16xbf16>, vector<16x64xbf16>, vector<16x64xf32> -> vector<16x64xf32>
    %24 = arith.truncf %23 : vector<16x64xf32> to vector<16x64xbf16>
    %cst_16 = arith.constant dense<0.000000e+00> : vector<16x128xf32>
    %25 = tpu.matmul %24, %22, %cst_16 {dimension_numbers = #tpu.dot_dimension_numbers<[1], [0], [0], [1], [0, 0, 1, 1], [], []>} : vector<16x64xbf16>, vector<64x128xbf16>, vector<16x128xf32> -> vector<16x128xf32>
    %c2 = arith.constant 2 : index
    %c0_17 = arith.constant 0 : index
    %26 = vector.load %arg3[%c2, %c0_17] : memref<8x256xf32, #tpu.memory_space<vmem>>, vector<1x128xf32>
    %27 = vector.broadcast %26 : vector<1x128xf32> to vector<16x128xf32>
    %28 = arith.addf %25, %27 : vector<16x128xf32>
    %cst_18 = arith.constant 0.000000e+00 : f32
    %29 = vector.broadcast %cst_18 : f32 to vector<16x128xf32>
    %30 = arith.maximumf %28, %29 : vector<16x128xf32>
    %31 = arith.truncf %30 : vector<16x128xf32> to vector<16x128xbf16>
    %c112 = arith.constant 112 : index
    %c0_19 = arith.constant 0 : index
    %32 = vector.load %arg2[%c112, %c0_19] : memref<688x256xbf16, #tpu.memory_space<vmem>>, vector<128x256xbf16>
    %cst_20 = arith.constant dense<0.000000e+00> : vector<16x256xf32>
    %33 = tpu.matmul %31, %32, %cst_20 {dimension_numbers = #tpu.dot_dimension_numbers<[1], [0], [0], [1], [0, 0, 1, 1], [], []>} : vector<16x128xbf16>, vector<128x256xbf16>, vector<16x256xf32> -> vector<16x256xf32>
    %c3 = arith.constant 3 : index
    %c0_21 = arith.constant 0 : index
    %34 = vector.load %arg3[%c3, %c0_21] : memref<8x256xf32, #tpu.memory_space<vmem>>, vector<1x256xf32>
    %35 = vector.broadcast %34 : vector<1x256xf32> to vector<16x256xf32>
    %36 = arith.addf %33, %35 : vector<16x256xf32>
    %cst_22 = arith.constant 0.000000e+00 : f32
    %37 = vector.broadcast %cst_22 : f32 to vector<16x256xf32>
    %38 = arith.maximumf %36, %37 : vector<16x256xf32>
    %39 = arith.truncf %38 : vector<16x256xf32> to vector<16x256xbf16>
    %c240 = arith.constant 240 : index
    %c0_23 = arith.constant 0 : index
    %40 = vector.load %arg2[%c240, %c0_23] : memref<688x256xbf16, #tpu.memory_space<vmem>>, vector<256x128xbf16>
    %cst_24 = arith.constant dense<0.000000e+00> : vector<16x128xf32>
    %41 = tpu.matmul %39, %40, %cst_24 {dimension_numbers = #tpu.dot_dimension_numbers<[1], [0], [0], [1], [0, 0, 1, 1], [], []>} : vector<16x256xbf16>, vector<256x128xbf16>, vector<16x128xf32> -> vector<16x128xf32>
    %c4 = arith.constant 4 : index
    %c0_25 = arith.constant 0 : index
    %42 = vector.load %arg3[%c4, %c0_25] : memref<8x256xf32, #tpu.memory_space<vmem>>, vector<1x128xf32>
    %43 = vector.broadcast %42 : vector<1x128xf32> to vector<16x128xf32>
    %44 = arith.addf %41, %43 : vector<16x128xf32>
    %cst_26 = arith.constant 0.000000e+00 : f32
    %45 = vector.broadcast %cst_26 : f32 to vector<16x128xf32>
    %46 = arith.maximumf %44, %45 : vector<16x128xf32>
    %47 = arith.truncf %46 : vector<16x128xf32> to vector<16x128xbf16>
    %c496 = arith.constant 496 : index
    %c0_27 = arith.constant 0 : index
    %48 = vector.load %arg2[%c496, %c0_27] : memref<688x256xbf16, #tpu.memory_space<vmem>>, vector<128x64xbf16>
    %cst_28 = arith.constant dense<0.000000e+00> : vector<16x64xf32>
    %49 = tpu.matmul %47, %48, %cst_28 {dimension_numbers = #tpu.dot_dimension_numbers<[1], [0], [0], [1], [0, 0, 1, 1], [], []>} : vector<16x128xbf16>, vector<128x64xbf16>, vector<16x64xf32> -> vector<16x64xf32>
    %c5 = arith.constant 5 : index
    %c0_29 = arith.constant 0 : index
    %50 = vector.load %arg3[%c5, %c0_29] : memref<8x256xf32, #tpu.memory_space<vmem>>, vector<1x64xf32>
    %51 = vector.broadcast %50 : vector<1x64xf32> to vector<16x64xf32>
    %52 = arith.addf %49, %51 : vector<16x64xf32>
    %cst_30 = arith.constant 0.000000e+00 : f32
    %53 = vector.broadcast %cst_30 : f32 to vector<16x64xf32>
    %54 = arith.maximumf %52, %53 : vector<16x64xf32>
    %55 = arith.truncf %54 : vector<16x64xf32> to vector<16x64xbf16>
    %c624 = arith.constant 624 : index
    %c0_31 = arith.constant 0 : index
    %56 = vector.load %arg2[%c624, %c0_31] : memref<688x256xbf16, #tpu.memory_space<vmem>>, vector<64x128xbf16>
    %cst_32 = arith.constant dense<0.000000e+00> : vector<16x128xf32>
    %57 = tpu.matmul %55, %56, %cst_32 {dimension_numbers = #tpu.dot_dimension_numbers<[1], [0], [0], [1], [0, 0, 1, 1], [], []>} : vector<16x64xbf16>, vector<64x128xbf16>, vector<16x128xf32> -> vector<16x128xf32>
    %c6 = arith.constant 6 : index
    %c0_33 = arith.constant 0 : index
    %58 = vector.load %arg3[%c6, %c0_33] : memref<8x256xf32, #tpu.memory_space<vmem>>, vector<1x128xf32>
    %59 = vector.broadcast %58 : vector<1x128xf32> to vector<16x128xf32>
    %60 = arith.addf %57, %59 : vector<16x128xf32>
    %61 = vector.extract_strided_slice %60 {offsets = [0, 0], sizes = [16, 4], strides = [1, 1]} : vector<16x128xf32> to vector<16x4xf32>
    %c0_34 = arith.constant 0 : index
    %c0_35 = arith.constant 0 : index
    %62 = vector.load %arg4[%c0_34, %c0_35] : memref<16x4xf32, #tpu.memory_space<vmem>>, vector<16x4xf32>
    tpu.vector_store %arg4[%c0_34, %c0_35], %61 {strides = array<i32>} : memref<16x4xf32, #tpu.memory_space<vmem>>, vector<16x4xf32>,
    return
  }
}

</mosaic_0001>

<bundles_post_ra>
// kernel: tpu_custom_call.1
= control target key start
LH: loop header
LB: loop body
LE: loop exit
PB: predicated region body
PF: predicated region fallthrough
CT: control target
= control target key end

     0   :  { %9 = vsyncpa [#allocation3], 0  ;;  %s1142_s0 = inlined_call_operand.hbm [shape: bf16[16,16], index: 0, kind: input, shape index: {}]   ;;  %s1143_s1 = inlined_call_operand.hbm [shape: bf16[16,16], index: 1, kind: input, shape index: {}]   ;;  %s1144_s2 = inlined_call_operand.hbm [shape: bf16[688,256], index: 2, kind: input, shape index: {}]   ;;  %s1145_s3 = inlined_call_operand.hbm [shape: f32[8,256], index: 3, kind: input, shape index: {}]   ;;  %s1146_s4 = inlined_call_operand.vmem [shape: f32[16,4], index: 4, kind: output, shape index: {}]  }
   0x1   :  { %10 = vsyncpa [#allocation5], 0 }
   0x2   :  { %11 = vsyncpa [#allocation8], 0  ;;  %s29_s17 = sshll.u32 %s1143_s1, 4  ;;  %s1085_s18 = smov [#allocation4]   ;;  %s30_s17 = int_to_ptr.hbm [resolvable:$true] %s29_s17 }
   0x3   :  { %s31_s19 = sshll.u32 %s1085_s18, 4  ;;  %s16_s22 = sshll.u32 %s1142_s0, 4  ;;  %s32_s19 = int_to_ptr.vmem [resolvable:$true] %s31_s19  ;;  %s17_s22 = int_to_ptr.hbm [resolvable:$true] %s16_s22 }
   0x4   :  { %s1086_s23 = smov 64   ;;  %s1087_s24 = smov 4  }
   0x5   :  { %37 = dma.hbm_to_vmem [thread:$0]  %s30_s17, 128, %s32_s19, [#allocation5], %s1086_s23, %s1086_s23, %s1087_s24  }
   0x6   :  { %s1088_s25 = smov [#allocation2]   ;;  %s42_s29 = sshll.u32 %s1144_s2, 4  ;;  %s43_s29 = int_to_ptr.hbm [resolvable:$true] %s42_s29 }
   0x7   :  { %s18_s26 = sshll.u32 %s1088_s25, 4  ;;  %s1089_s1 = smov [#allocation6]   ;;  %s19_s26 = int_to_ptr.vmem [resolvable:$true] %s18_s26 }
   0x8   :  { %24 = dma.hbm_to_vmem [thread:$0]  %s17_s22, 128, %s19_s26, [#allocation3], %s1086_s23, %s1086_s23, %s1087_s24  }
   0x9   :  { %s44_s30 = sshll.u32 %s1089_s1, 4  ;;  %s56_s0 = sshll.u32 %s1145_s3, 4  ;;  %s45_s30 = int_to_ptr.vmem [resolvable:$true] %s44_s30  ;;  %s57_s0 = int_to_ptr.hbm [resolvable:$true] %s56_s0 }
   0xa   :  { %s1090_s7 = smov 128   ;;  %s1091_s8 = smov 8  }
   0xb   :  { %50 = dma.hbm_to_vmem [thread:$0]  %s43_s29, 11008, %s45_s30, [#allocation5], %s1090_s7, %s1090_s7, %s1091_s8  }
   0xc   :  { %s1092_s9 = smov [#allocation7]  }
   0xd   :  { %s58_s10 = sshll.u32 %s1092_s9, 4  ;;  %s59_s10 = int_to_ptr.vmem [resolvable:$true] %s58_s10 }
   0xe   :  { %61 = dma.hbm_to_vmem [thread:$0]  %s57_s0, 256, %s59_s10, [#allocation8]  }
   0xf   :  { %1079 = dma.done.wait [#allocation3], 128  }
  0x10   :  { %1080 = vsyncadd [#allocation3], 4294967168 }
  0x11   :  { %1081 = dma.done.wait [#allocation5], 11136  }
  0x12   :  { %1082 = vsyncadd [#allocation5], 4294956160 }
  0x13   :  { %1083 = dma.done.wait [#allocation8], 256  }
  0x14   :  { %1084 = vsyncadd [#allocation8], 4294967040  ;;  %v923_v0 = vld [vmem:[#allocation4] sm:$0xff]  ;;  %v922_v1 = vld [vmem:[#allocation2] sm:$0xff]  ;;  %vm96_vm0 = vcmask 130048   ;;  %vm174_vm1 = vcmask 261120  }
  0x15   :  { %107 = vmatpush.bf16.msra.mxu0 %v923_v0  ;;  %v714_v2 = vld [vmem:[#allocation6] sm:$0xf]  ;;  %v924_v3 = vld [vmem:[#allocation6 + $0x4] sm:$0xf0]  ;;  %v115_v9 = vld [vmem:[#allocation7] ss:$0 sm:$0xff] }
  0x16   :  { %v715_v4 = vor.u32 %v924_v3, %v714_v2  ;;  %v724_v16 = vld [vmem:[#allocation6 + $0x20] sm:$0xf]  ;;  %v926_v17 = vld [vmem:[#allocation6 + $0x24] sm:$0xf0]  ;;  %v720_v19 = vld [vmem:[#allocation6 + $0x10] sm:$0xf] }
  0x17   :  { %v725_v18 = vor.u32 %v926_v17, %v724_v16  ;;  %v925_v20 = vld [vmem:[#allocation6 + $0x14] sm:$0xf0]  ;;  %v742_v25 = vld [vmem:[#allocation6 + $0x60] sm:$0xf]  ;;  %v930_v26 = vld [vmem:[#allocation6 + $0x64] sm:$0xf0] }
  0x18   :  { %711 = vmatmul.msk.bf16.vlgmr.msra.gmra.mxu0 %vm96_vm0, %v922_v1  ;;  %132 = vmatpush.bf16.msra.mxu1 %v715_v4  ;;  %v721_v21 = vor.u32 %v925_v20, %v720_v19  ;;  %v743_v27 = vor.u32 %v930_v26, %v742_v25  ;;  %v161_v29 = vld [vmem:[#allocation7 + $0x1] ss:$0 sm:$0xff]  ;;  %v929_v37 = vld [vmem:[#allocation6 + $0x54] sm:$0xf0]  ;;  %v734_v39 = vld [vmem:[#allocation6 + $0x40] sm:$0xf] }
  0x19   :  { %184 = vmatpush.bf16.msra.mxu3 %v725_v18  ;;  %v738_v36 = vld [vmem:[#allocation6 + $0x50] sm:$0xf]  ;;  %v928_v40 = vld [vmem:[#allocation6 + $0x44] sm:$0xf0]  ;;  %v927_v43 = vld [vmem:[#allocation6 + $0x34] sm:$0xf0] }
  0x1a   :  { %v739_v38 = vor.u32 %v929_v37, %v738_v36  ;;  %v735_v41 = vor.u32 %v928_v40, %v734_v39  ;;  %v730_v42 = vld [vmem:[#allocation6 + $0x30] sm:$0xf]  ;;  %v803_v45 = vld [vmem:[#allocation6 + $0xe0] sm:$0xf]  ;;  %v946_v46 = vld [vmem:[#allocation6 + $0xe4] sm:$0xf0] }
  0x1b   :  { %v731_v44 = vor.u32 %v927_v43, %v730_v42  ;;  %v945_v47 = vld [vmem:[#allocation6 + $0xe4] sm:$0xf]  ;;  %v804_v48 = vor.u32 %v946_v46, %v803_v45  ;;  %v805_v49 = vld [vmem:[#allocation6 + $0xe8] sm:$0xf0]  ;;  %v795_v50 = vld [vmem:[#allocation6 + $0xd0] sm:$0xf] }
  0x1c   :  { %251 = vmatpush.bf16.msrb.mxu1 %v743_v27  ;;  %v944_v51 = vld [vmem:[#allocation6 + $0xd4] sm:$0xf0]  ;;  %v808_v52 = vor.u32 %v945_v47, %v805_v49  ;;  %v943_v53 = vld [vmem:[#allocation6 + $0xd4] sm:$0xf]  ;;  %v797_v54 = vld [vmem:[#allocation6 + $0xd8] sm:$0xf0] }
  0x1d   :  { %185 = vmatpush.bf16.msra.mxu3 %v721_v21  ;;  %v796_v55 = vor.u32 %v944_v51, %v795_v50  ;;  %v800_v56 = vor.u32 %v943_v53, %v797_v54  ;;  %v787_v57 = vld [vmem:[#allocation6 + $0xc0] sm:$0xf]  ;;  %v942_v58 = vld [vmem:[#allocation6 + $0xc4] sm:$0xf0]  ;;  %v941_v59 = vld [vmem:[#allocation6 + $0xc4] sm:$0xf] }
  0x1e   :  { %v789_v60 = vld [vmem:[#allocation6 + $0xc8] sm:$0xf0]  ;;  %v788_v61 = vor.u32 %v942_v58, %v787_v57  ;;  %v779_v63 = vld [vmem:[#allocation6 + $0xb0] sm:$0xf]  ;;  %v940_v0 = vld [vmem:[#allocation6 + $0xb4] sm:$0xf0] }
  0x1f   :  { %v792_v62 = vor.u32 %v941_v59, %v789_v60  ;;  %v781_v2 = vld [vmem:[#allocation6 + $0xb8] sm:$0xf0]  ;;  %v780_v3 = vor.u32 %v940_v0, %v779_v63  ;;  %vm243_vm2 = vcmask 523264   ;;  %v935_v16 = vld [vmem:[#allocation6 + $0x94] sm:$0xf]  ;;  %vm693_vm3 = vcmask 31744  }
  0x20   :  { %252 = vmatpush.bf16.msrb.mxu1 %v739_v38  ;;  %v765_v18 = vld [vmem:[#allocation6 + $0x98] sm:$0xf0]  ;;  %v755_v20 = vld [vmem:[#allocation6 + $0x80] sm:$0xf]  ;;  %v934_v21 = vld [vmem:[#allocation6 + $0x84] sm:$0xf0] }
  0x21   :  { %381 = vmatpush.bf16.msrb.mxu3 %v808_v52  ;;  %v768_v19 = vor.u32 %v935_v16, %v765_v18  ;;  %v747_v26 = vld [vmem:[#allocation6 + $0x70] sm:$0xf]  ;;  %v932_v27 = vld [vmem:[#allocation6 + $0x74] sm:$0xf0]  ;;  %v962_v36 = vld [vmem:[#allocation6 + $0x1e4] sm:$0xf0] }
  0x22   :  { %v835_v37 = vld [vmem:[#allocation6 + $0x150] sm:$0xf]  ;;  %v953_v38 = vld [vmem:[#allocation6 + $0x154] sm:$0xf0]  ;;  %v952_v45 = vld [vmem:[#allocation6 + $0x144] sm:$0xf0] }
  0x23   :  { %v867_v40 = vld [vmem:[#allocation6 + $0x1d0] sm:$0xf]  ;;  %v836_v42 = vor.u32 %v953_v38, %v835_v37  ;;  %v863_v46 = vld [vmem:[#allocation6 + $0x1c0] sm:$0xf]  ;;  %v960_v47 = vld [vmem:[#allocation6 + $0x1c4] sm:$0xf0] }
  0x24   :  { %253 = vmatpush.bf16.msrb.mxu1 %v735_v41  ;;  %v961_v41 = vld [vmem:[#allocation6 + $0x1d4] sm:$0xf0]  ;;  %v864_v49 = vor.u32 %v960_v47, %v863_v46  ;;  %v827_v50 = vld [vmem:[#allocation6 + $0x130] sm:$0xf]  ;;  %v823_v0 = vld [vmem:[#allocation6 + $0x120] sm:$0xf] }
  0x25   :  { %382 = vmatpush.bf16.msrb.mxu3 %v800_v56  ;;  %v868_v43 = vor.u32 %v961_v41, %v867_v40  ;;  %v951_v51 = vld [vmem:[#allocation6 + $0x134] sm:$0xf0]  ;;  %v859_v52 = vld [vmem:[#allocation6 + $0x1b0] sm:$0xf]  ;;  %v956_v16 = vld [vmem:[#allocation6 + $0x184] sm:$0xf0] }
  0x26   :  { %v959_v53 = vld [vmem:[#allocation6 + $0x1b4] sm:$0xf0]  ;;  %v828_v54 = vor.u32 %v951_v51, %v827_v50  ;;  %v218_v57 = vld [vmem:[#allocation7 + $0x2] ss:$0 sm:$0xff] }
  0x27   :  { %v811_v18 = vld [vmem:[#allocation6 + $0xf0] sm:$0xf] }
  0x28   :  { %254 = vmatpush.bf16.msrb.mxu1 %v731_v44  ;;  %v831_v44 = vld [vmem:[#allocation6 + $0x140] sm:$0xf] }
  0x29   :  { %383 = vmatpush.bf16.msrb.mxu3 %v792_v62 }
  0x95   :  { %v109_v5 = vpop.f32.mrf.mxu0 }
  0x9d   :  { %v111_v6 = vpop.f32.mrf.mxu0 }
  0x9e   :  { %v114_v7 = vpack.c.bf16 %v111_v6, %v109_v5 }
  0xa0   :  { %716 = vmatmul.msk.bf16.vlgmr.msra.gmra.mxu1 %vm96_vm0, %v114_v7 }
 0x11d   :  { %v134_v8 = vpop.f32.mrf.mxu1 }
 0x11e   :  { %v135_v10 = vadd.f32 %v134_v8, %v115_v9  ;;  %v771_v8 = vld [vmem:[#allocation6 + $0xa0] sm:$0xf] }
 0x120   :  { %v139_v13 = vmax.f32 %v135_v10, 0.0  ;;  %v937_v10 = vld [vmem:[#allocation6 + $0xa4] sm:$0xf] }
 0x125   :  { %v136_v11 = vpop.f32.mrf.mxu1 }
 0x126   :  { %v137_v12 = vadd.f32 %v136_v11, %v115_v9  ;;  %v938_v9 = vld [vmem:[#allocation6 + $0xa4] sm:$0xf0] }
 0x127   :  { %v772_v11 = vor.u32 %v938_v9, %v771_v8  ;;  %v851_v8 = vld [vmem:[#allocation6 + $0x190] sm:$0xf] }
 0x128   :  { %v140_v14 = vmax.f32 %v137_v12, 0.0  ;;  %v773_v12 = vld [vmem:[#allocation6 + $0xa8] sm:$0xf0] }
 0x12a   :  { %v141_v15 = vpack.c.bf16 %v140_v14, %v139_v13  ;;  %v776_v13 = vor.u32 %v937_v10, %v773_v12  ;;  %v763_v14 = vld [vmem:[#allocation6 + $0x90] sm:$0xf]  ;;  %v957_v10 = vld [vmem:[#allocation6 + $0x194] sm:$0xf0]  ;;  %v815_v12 = vld [vmem:[#allocation6 + $0x100] sm:$0xf] }
 0x12c   :  { %153 = vmatpush.bf16.msra.mxu2 %v141_v15  ;;  %v936_v15 = vld [vmem:[#allocation6 + $0x94] sm:$0xf0] }
 0x12d   :  { %v764_v17 = vor.u32 %v936_v15, %v763_v14  ;;  %v847_v14 = vld [vmem:[#allocation6 + $0x180] sm:$0xf] }
 0x12f   :  { %717 = vmatmul.msk.bf16.vlgmr.msra.gmra.mxu2 %vm96_vm0, %v922_v1 }
 0x130   :  { %367 = vmatpush.bf16.msrb.mxu2 %v804_v48  ;;  %v832_v48 = vor.u32 %v952_v45, %v831_v44 }
 0x134   :  { %368 = vmatpush.bf16.msrb.mxu2 %v796_v55  ;;  %v860_v55 = vor.u32 %v959_v53, %v859_v52  ;;  %v887_v53 = vld [vmem:[#allocation6 + $0x220] sm:$0xf] }
 0x138   :  { %369 = vmatpush.bf16.msrb.mxu2 %v788_v61 }
 0x13c   :  { %370 = vmatpush.bf16.msrb.mxu2 %v780_v3 }
 0x140   :  { %371 = vmatpush.bf16.msrb.mxu2 %v772_v11  ;;  %v852_v11 = vor.u32 %v957_v10, %v851_v8 }
 0x144   :  { %372 = vmatpush.bf16.msrb.mxu2 %v764_v17  ;;  %v848_v17 = vor.u32 %v956_v16, %v847_v14  ;;  %v974_v14 = vld [vmem:[#allocation6 + $0x2a4] sm:$0xf0]  ;;  %v915_v16 = vld [vmem:[#allocation6 + $0x290] sm:$0xf] }
 0x1b2   :  { %v155_v22 = vpop.f32.mrf.mxu2 }
 0x1ba   :  { %v157_v23 = vpop.f32.mrf.mxu2 }
 0x1bb   :  { %v160_v24 = vpack.c.bf16 %v157_v23, %v155_v22  ;;  %v933_v22 = vld [vmem:[#allocation6 + $0x84] sm:$0xf]  ;;  %v756_v23 = vor.u32 %v934_v21, %v755_v20  ;;  %v843_v20 = vld [vmem:[#allocation6 + $0x170] sm:$0xf] }
 0x1bd   :  { %726 = vmatmul.msk.bf16.vlgmr.msra.gmra.mxu3 %vm174_vm1, %v160_v24  ;;  %v757_v24 = vld [vmem:[#allocation6 + $0x88] sm:$0xf0]  ;;  %373 = vmatpush.bf16.msrb.mxu2 %v756_v23 }
 0x1be   :  { %v760_v25 = vor.u32 %v933_v22, %v757_v24  ;;  %v955_v22 = vld [vmem:[#allocation6 + $0x174] sm:$0xf0]  ;;  %v903_v24 = vld [vmem:[#allocation6 + $0x260] sm:$0xf] }
 0x1bf   :  { %v844_v23 = vor.u32 %v955_v22, %v843_v20  ;;  %v972_v20 = vld [vmem:[#allocation6 + $0x284] sm:$0xf0]  ;;  %v907_v22 = vld [vmem:[#allocation6 + $0x270] sm:$0xf] }
 0x240   :  { %v187_v28 = vpop.f32.mrf.mxu3 }
 0x241   :  { %v188_v30 = vadd.f32 %v187_v28, %v161_v29  ;;  %v931_v28 = vld [vmem:[#allocation6 + $0x74] sm:$0xf] }
 0x243   :  { %v192_v33 = vmax.f32 %v188_v30, 0.0  ;;  %v749_v30 = vld [vmem:[#allocation6 + $0x78] sm:$0xf0] }
 0x248   :  { %v189_v31 = vpop.f32.mrf.mxu3 }
 0x249   :  { %v190_v32 = vadd.f32 %v189_v31, %v161_v29  ;;  %v748_v29 = vor.u32 %v932_v27, %v747_v26  ;;  %v752_v31 = vor.u32 %v931_v28, %v749_v30  ;;  %v899_v26 = vld [vmem:[#allocation6 + $0x250] sm:$0xf]  ;;  %v969_v28 = vld [vmem:[#allocation6 + $0x254] sm:$0xf0]  ;;  %v895_v30 = vld [vmem:[#allocation6 + $0x240] sm:$0xf] }
 0x24b   :  { %v193_v34 = vmax.f32 %v190_v32, 0.0  ;;  %374 = vmatpush.bf16.msrb.mxu2 %v748_v29  ;;  %v839_v32 = vld [vmem:[#allocation6 + $0x160] sm:$0xf]  ;;  %v900_v29 = vor.u32 %v969_v28, %v899_v26  ;;  %v577_v26 = vld [vmem:[#allocation7 + $0x5] ss:$0 sm:$0xff] }
 0x24d   :  { %v194_v35 = vpack.c.bf16 %v193_v34, %v192_v33  ;;  %v954_v33 = vld [vmem:[#allocation6 + $0x164] sm:$0xf0]  ;;  %v871_v34 = vld [vmem:[#allocation6 + $0x1e0] sm:$0xf] }
 0x24e   :  { %v872_v39 = vor.u32 %v962_v36, %v871_v34  ;;  %v967_v34 = vld [vmem:[#allocation6 + $0x234] sm:$0xf0] }
 0x24f   :  { %210 = vmatpush.bf16.msrb.mxu0 %v194_v35  ;;  %v840_v35 = vor.u32 %v954_v33, %v839_v32  ;;  %v891_v33 = vld [vmem:[#allocation6 + $0x230] sm:$0xf] }
 0x250   :  { %544 = vmatpush.bf16.msra.mxu1 %v872_v39  ;;  %v281_v36 = vld [vmem:[#allocation7 + $0x3] ss:$8 sm:$0x3] }
 0x251   :  { %v283_v39 = vperm.slane %v281_v36, 0  ;;  %v284_v40 = vperm.slane %v281_v36, 1 }
 0x252   :  { %727 = vmatmul.msk.bf16.vlgmr.msrb.gmra.mxu0 %vm96_vm0, %v922_v1  ;;  %v939_v1 = vld [vmem:[#allocation6 + $0xb4] sm:$0xf] }
 0x253   :  { %v784_v4 = vor.u32 %v939_v1, %v781_v2  ;;  %530 = vmatpush.bf16.msra.mxu0 %v840_v35  ;;  %v950_v1 = vld [vmem:[#allocation6 + $0x124] sm:$0xf0]  ;;  %v855_v2 = vld [vmem:[#allocation6 + $0x1a0] sm:$0xf]  ;;  %v892_v35 = vor.u32 %v967_v34, %v891_v33  ;;  %v651_v33 = vld [vmem:[#allocation7 + $0x6] ss:$0 sm:$0xff] }
 0x254   :  { %545 = vmatpush.bf16.msra.mxu1 %v868_v43  ;;  %v824_v3 = vor.u32 %v950_v1, %v823_v0 }
 0x255   :  { %384 = vmatpush.bf16.msrb.mxu3 %v784_v4  ;;  %v958_v4 = vld [vmem:[#allocation6 + $0x1a4] sm:$0xf0] }
 0x257   :  { %531 = vmatpush.bf16.msra.mxu0 %v836_v42 }
 0x258   :  { %546 = vmatpush.bf16.msra.mxu1 %v864_v49 }
 0x259   :  { %385 = vmatpush.bf16.msrb.mxu3 %v776_v13  ;;  %v948_v13 = vld [vmem:[#allocation6 + $0x104] sm:$0xf0] }
 0x25a   :  { %v816_v15 = vor.u32 %v948_v13, %v815_v12  ;;  %v919_v13 = vld [vmem:[#allocation6 + $0x2a0] sm:$0xf] }
 0x25b   :  { %532 = vmatpush.bf16.msra.mxu0 %v832_v48 }
 0x25c   :  { %547 = vmatpush.bf16.msra.mxu1 %v860_v55 }
 0x25d   :  { %386 = vmatpush.bf16.msrb.mxu3 %v768_v19  ;;  %v947_v19 = vld [vmem:[#allocation6 + $0xf4] sm:$0xf0] }
 0x25e   :  { %v812_v21 = vor.u32 %v947_v19, %v811_v18  ;;  %v911_v19 = vld [vmem:[#allocation6 + $0x280] sm:$0xf] }
 0x25f   :  { %533 = vmatpush.bf16.msra.mxu0 %v828_v54  ;;  %v966_v54 = vld [vmem:[#allocation6 + $0x224] sm:$0xf0] }
 0x260   :  { %v888_v55 = vor.u32 %v966_v54, %v887_v53 }
 0x261   :  { %387 = vmatpush.bf16.msrb.mxu3 %v760_v25  ;;  %v970_v25 = vld [vmem:[#allocation6 + $0x264] sm:$0xf0] }
 0x262   :  { %v904_v27 = vor.u32 %v970_v25, %v903_v24 }
 0x263   :  { %534 = vmatpush.bf16.msra.mxu0 %v824_v3  ;;  %v433_v3 = vld [vmem:[#allocation7 + $0x4] ss:$0 sm:$0xff] }
 0x264   :  { %626 = vmatpush.bf16.msra.mxu2 %v904_v27 }
 0x265   :  { %388 = vmatpush.bf16.msrb.mxu3 %v752_v31  ;;  %v968_v31 = vld [vmem:[#allocation6 + $0x244] sm:$0xf0] }
 0x266   :  { %v896_v32 = vor.u32 %v968_v31, %v895_v30 }
 0x268   :  { %627 = vmatpush.bf16.msra.mxu2 %v900_v29 }
 0x26c   :  { %628 = vmatpush.bf16.msra.mxu2 %v896_v32 }
 0x270   :  { %629 = vmatpush.bf16.msra.mxu2 %v892_v35 }
 0x274   :  { %630 = vmatpush.bf16.msra.mxu2 %v888_v55 }
 0x2cf   :  { %v212_v5 = vpop.f32.mrf.mxu0 }
 0x2d7   :  { %v214_v6 = vpop.f32.mrf.mxu0 }
 0x2d8   :  { %v217_v7 = vpack.c.bf16 %v214_v6, %v212_v5  ;;  %v856_v5 = vor.u32 %v958_v4, %v855_v2  ;;  %v819_v6 = vld [vmem:[#allocation6 + $0x110] sm:$0xf] }
 0x2da   :  { %744 = vmatmul.msk.bf16.vlgmr.msrb.gmra.mxu1 %vm243_vm2, %v217_v7  ;;  %v949_v7 = vld [vmem:[#allocation6 + $0x114] sm:$0xf0] }
 0x2db   :  { %548 = vmatpush.bf16.msra.mxu1 %v856_v5  ;;  %v820_v9 = vor.u32 %v949_v7, %v819_v6 }
 0x2dd   :  { %535 = vmatpush.bf16.msra.mxu0 %v820_v9 }
 0x2df   :  { %549 = vmatpush.bf16.msra.mxu1 %v852_v11 }
 0x2e1   :  { %536 = vmatpush.bf16.msra.mxu0 %v816_v15  ;;  %v920_v15 = vor.u32 %v974_v14, %v919_v13 }
 0x2e3   :  { %550 = vmatpush.bf16.msra.mxu1 %v848_v17  ;;  %683 = vmatpush.bf16.msra.mxu3 %v920_v15  ;;  %v973_v17 = vld [vmem:[#allocation6 + $0x294] sm:$0xf0] }
 0x2e4   :  { %v916_v18 = vor.u32 %v973_v17, %v915_v16 }
 0x2e5   :  { %537 = vmatpush.bf16.msra.mxu0 %v812_v21  ;;  %v912_v21 = vor.u32 %v972_v20, %v911_v19 }
 0x2e7   :  { %551 = vmatpush.bf16.msra.mxu1 %v844_v23  ;;  %684 = vmatpush.bf16.msra.mxu3 %v916_v18  ;;  %v971_v23 = vld [vmem:[#allocation6 + $0x274] sm:$0xf0] }
 0x2e8   :  { %v908_v24 = vor.u32 %v971_v23, %v907_v22 }
 0x2eb   :  { %685 = vmatpush.bf16.msra.mxu3 %v912_v21 }
 0x2ef   :  { %686 = vmatpush.bf16.msra.mxu3 %v908_v24 }
 0x357   :  { %v256_v56 = vpop.f32.mrf.mxu1 }
 0x358   :  { %v257_v58 = vadd.f32 %v256_v56, %v218_v57  ;;  %v883_v56 = vld [vmem:[#allocation6 + $0x210] sm:$0xf] }
 0x35a   :  { %v261_v61 = vmax.f32 %v257_v58, 0.0 }
 0x35f   :  { %v258_v59 = vpop.f32.mrf.mxu1 }
 0x360   :  { %v259_v60 = vadd.f32 %v258_v59, %v218_v57  ;;  %v965_v57 = vld [vmem:[#allocation6 + $0x214] sm:$0xf0]  ;;  %v879_v59 = vld [vmem:[#allocation6 + $0x200] sm:$0xf] }
 0x361   :  { %v884_v58 = vor.u32 %v965_v57, %v883_v56 }
 0x362   :  { %v262_v62 = vmax.f32 %v259_v60, 0.0  ;;  %v964_v60 = vld [vmem:[#allocation6 + $0x204] sm:$0xf0] }
 0x363   :  { %631 = vmatpush.bf16.msra.mxu2 %v884_v58 }
 0x364   :  { %v263_v63 = vpack.c.bf16 %v262_v62, %v261_v61  ;;  %v880_v61 = vor.u32 %v964_v60, %v879_v59  ;;  %v875_v62 = vld [vmem:[#allocation6 + $0x1f0] sm:$0xf] }
 0x366   :  { %375 = vmatmul.bf16.vlgmr.msrb.gmra.mxu2 %v263_v63  ;;  %389 = vmatmul.bf16.vlgmr.msrb.gmra.mxu3 %v263_v63  ;;  %v963_v63 = vld [vmem:[#allocation6 + $0x1f4] sm:$0xf0] }
 0x367   :  { %632 = vmatpush.bf16.msra.mxu2 %v880_v61  ;;  %v876_v0 = vor.u32 %v963_v63, %v875_v62 }
 0x36b   :  { %633 = vmatpush.bf16.msra.mxu2 %v876_v0 }
 0x3e9   :  { %v376_v37 = vpop.f32.mrf.mxu2  ;;  %v390_v38 = vpop.f32.mrf.mxu3 }
 0x3ea   :  { %v377_v41 = vadd.f32 %v376_v37, %v283_v39  ;;  %v391_v42 = vadd.f32 %v390_v38, %v284_v40 }
 0x3ec   :  { %v395_v47 = vmax.f32 %v377_v41, 0.0  ;;  %v396_v48 = vmax.f32 %v391_v42, 0.0 }
 0x3f1   :  { %v378_v43 = vpop.f32.mrf.mxu2  ;;  %v392_v44 = vpop.f32.mrf.mxu3 }
 0x3f2   :  { %v379_v45 = vadd.f32 %v378_v43, %v283_v39  ;;  %v393_v46 = vadd.f32 %v392_v44, %v284_v40 }
 0x3f4   :  { %v397_v49 = vmax.f32 %v379_v45, 0.0  ;;  %v398_v50 = vmax.f32 %v393_v46, 0.0 }
 0x3f6   :  { %v399_v51 = vpack.c.bf16 %v397_v49, %v395_v47  ;;  %v400_v52 = vpack.c.bf16 %v398_v50, %v396_v48 }
 0x3f8   :  { %538 = vmatmul.bf16.vlgmr.msra.gmra.mxu0 %v399_v51  ;;  %552 = vmatmul.bf16.vlgmr.msra.gmra.mxu1 %v400_v52 }
 0x475   :  { %v539_v1 = vpop.f32.mrf.mxu0  ;;  %v553_v2 = vpop.f32.mrf.mxu1 }
 0x476   :  { %v540_v4 = vadd.f32 %v539_v1, %v433_v3 }
 0x478   :  { %v554_v6 = vadd.f32 %v553_v2, %v540_v4 }
 0x47a   :  { %v558_v10 = vmax.f32 %v554_v6, 0.0 }
 0x47d   :  { %v541_v5 = vpop.f32.mrf.mxu0  ;;  %v555_v8 = vpop.f32.mrf.mxu1 }
 0x47e   :  { %v542_v7 = vadd.f32 %v541_v5, %v433_v3 }
 0x480   :  { %v556_v9 = vadd.f32 %v555_v8, %v542_v7 }
 0x482   :  { %v559_v11 = vmax.f32 %v556_v9, 0.0 }
 0x484   :  { %v560_v12 = vpack.c.bf16 %v559_v11, %v558_v10 }
 0x486   :  { %634 = vmatmul.bf16.vlgmr.msra.gmra.mxu2 %v560_v12 }
 0x509   :  { %v635_v25 = vpop.f32.mrf.mxu2 }
 0x50a   :  { %v636_v27 = vadd.f32 %v635_v25, %v577_v26 }
 0x50c   :  { %v640_v30 = vmax.f32 %v636_v27, 0.0 }
 0x511   :  { %v637_v28 = vpop.f32.mrf.mxu2 }
 0x512   :  { %v638_v29 = vadd.f32 %v637_v28, %v577_v26 }
 0x514   :  { %v641_v31 = vmax.f32 %v638_v29, 0.0 }
 0x516   :  { %v642_v32 = vpack.c.bf16 %v641_v31, %v640_v30 }
 0x518   :  { %921 = vmatmul.msk.bf16.vlgmr.msra.gmra.mxu3 %vm243_vm2, %v642_v32 }
 0x59b   :  { %v688_v34 = vpop.f32.mrf.mxu3 }
 0x59c   :  { %v689_v35 = vadd.f32 %v688_v34, %v651_v33 }
 0x59e   :  { %694 = vst.msk [vmem:[%s1146_s4] sm:$0xff] %vm693_vm3, %v689_v35 }
 0x5a3   :  { %v690_v36 = vpop.f32.mrf.mxu3 }
 0x5a4   :  { %v691_v37 = vadd.f32 %v690_v36, %v651_v33 }
 0x5a6   :  { %695 = vst.msk [vmem:[%s1146_s4 + $0x8] sm:$0xff] %vm693_vm3, %v691_v37 }
 0x5a7   :  { %700 = vsyncpa [#allocation3], 1 }
 0x5a8   :  { %701 = vsyncpa [#allocation5], 1 }
 0x5a9   :  { %702 = vsyncpa [#allocation8], 1 }

</bundles_post_ra>
